<compile_context>
chip_gen: v7x
topology: tpu7x:2x2x1
jax: 0.10.0
libtpu: 0.0.40
codegen_flags: <defaults>
</compile_context>

<pallas_src>
import jax
import jax.numpy as jnp
from jax import lax
from jax.experimental import pallas as pl
from jax.experimental.pallas import tpu as pltpu


# ----------------------------------- kernel ---------------------------------------
def _make_kernel(C, tpix, HW, use_curriculum, use_kl, ragged):
    """Build a kernel specialized (at trace time) for the requested loss variant."""

    def kernel(*refs):
        if use_curriculum:
            feat_ref, teach_ref, ps_ref, gt_ref, out_ref = refs
        else:
            feat_ref, teach_ref, ps_ref, out_ref = refs
            gt_ref = None

        # (C, TPIX): classes on sublanes, pixels on lanes (lane-dense).
        x = feat_ref[0].astype(jnp.float32)
        y = teach_ref[0].astype(jnp.float32)
        ps = ps_ref[0]                       # (1, TPIX) int32 labels

        valid_pix = None
        if ragged:
            # Last pixel tile may read past HW: mask garbage pixels (logits -> 0,
            # labels -> -1) so their KL/MSE/CE contributions are exactly 0.
            base = pl.program_id(1) * tpix
            pix = base + lax.broadcasted_iota(jnp.int32, (1, tpix), 1)
            valid_pix = pix < HW
            x = jnp.where(valid_pix, x, 0.0)
            y = jnp.where(valid_pix, y, 0.0)
            ps = jnp.where(valid_pix, ps, -1)

        # --- student log-softmax pieces over the class (sublane) axis --------------
        x_max = jnp.max(x, axis=0, keepdims=True)
        x_sh = x - x_max
        x_exp = jnp.exp(x_sh)
        x_sum = jnp.sum(x_exp, axis=0, keepdims=True)
        lse_x = jnp.log(x_sum)               # log_softmax(x) = x_sh - lse_x

        # --- cross-entropy helper (ignore_index = -1) ------------------------------
        cid = lax.broadcasted_iota(jnp.int32, (C, tpix), 0)

        def ce(labels):
            picked = jnp.sum(jnp.where(cid == labels, x_sh, 0.0), axis=0, keepdims=True)
            valid = labels >= 0
            losses = jnp.where(valid, lse_x - picked, 0.0)   # -log_softmax at label
            return jnp.sum(losses), jnp.sum(valid.astype(jnp.float32))

        ce_ps_sum, cnt_ps = ce(ps)

        # --- teacher softmax pieces (shared by both consistency variants) ----------
        y_max = jnp.max(y, axis=0, keepdims=True)
        y_sh = y - y_max
        y_exp = jnp.exp(y_sh)
        y_sum = jnp.sum(y_exp, axis=0, keepdims=True)

        if use_kl:
            # sum_c p*(logp-logq) = sum_c y_exp*(y_sh-x_sh)/y_sum + (lse_x - log y_sum)
            kl_dot = jnp.sum(y_exp * (y_sh - x_sh), axis=0, keepdims=True)
            cons_rows = kl_dot / y_sum + (lse_x - jnp.log(y_sum))
            cons_sum = jnp.sum(cons_rows)
        else:
            inv_x = 1.0 / x_sum              # per-pixel exact divides (cheap, unbiased)
            inv_y = 1.0 / y_sum
            d = x_exp * inv_x - y_exp * inv_y
            cons_sum = jnp.sum(d * d)

        # --- lane-dense partial-sum tile (reduced over the grid in the wrapper) ----
        rid = lax.broadcasted_iota(jnp.int32, (8, 128), 0)
        tile = jnp.where(rid == 0, ce_ps_sum, 0.0)
        tile = jnp.where(rid == 1, cnt_ps, tile)
        tile = jnp.where(rid == 2, cons_sum, tile)
        if use_curriculum:
            gt = gt_ref[0]
            if ragged:
                gt = jnp.where(valid_pix, gt, -1)
            ce_gt_sum, cnt_gt = ce(gt)
            tile = jnp.where(rid == 3, ce_gt_sum, tile)
            tile = jnp.where(rid == 4, cnt_gt, tile)
        out_ref[0] = tile

    return kernel


# --------------------------------- tile sizing ------------------------------------
def _default_vmem_limit():
    try:
        kind = jax.devices()[0].device_kind.lower()
    except Exception:
        kind = ""
    if "v7" in kind:
        return 32 * 1024 * 1024          # v7x: 64 MiB physical per TC — stay conservative
    if "v5" in kind or "v6" in kind:
        return 64 * 1024 * 1024          # 128 MiB physical — allow bigger tiles
    return 32 * 1024 * 1024


def _auto_pixel_tile(C, in_itemsize, n_label_streams, vmem_limit_bytes):
    """Pick TPIX so pipeline buffers + in-kernel f32 temporaries fit the scoped budget."""
    budget = int(vmem_limit_bytes * 0.6)
    per_pix = (2 * 2 * C * in_itemsize        # feat + teacher, double-buffered
               + n_label_streams * 2 * 4      # int32 labels, double-buffered
               + 12 * C * 4                   # live f32 (C, TPIX) temporaries
               + 10 * 4)                      # (1, TPIX) f32/int rows
    tpix = budget // per_pix
    return int(max(128, min(32768, (tpix // 128) * 128)))


# ----------------------------------- wrapper --------------------------------------
def seg_mt_loss(feat, mask, teacher_feat, pseudo, epoch=0, *,
                alpha=1.0, w=0.5, use_curriculum=False, use_kl=True, T=120.0,
                tpix=None, vmem_limit_bytes=None):
    """Pallas TPU SegMTLoss.forward.

    feat/teacher_feat: (N, C, H, W) logits (f32 or bf16); mask/pseudo: (N, H, W) int,
    ignore_index = -1.
    """
    N, C, H, W = feat.shape
    assert teacher_feat.shape == feat.shape
    assert pseudo.shape == (N, H, W) and mask.shape == (N, H, W)
    HW = H * W
    M = N * HW

    # Native layout: pure reshapes only (no transpose -> no extra HBM pass).
    f3 = feat.reshape(N, C, HW)
    t3 = teacher_feat.reshape(N, C, HW)
    ps = pseudo.reshape(N, 1, HW).astype(jnp.int32)
    inputs = [f3, t3, ps]
    n_labels = 1
    if use_curriculum:
        gt = mask.reshape(N, 1, HW).astype(jnp.int32)
        inputs.append(gt)
        n_labels = 2

    if vmem_limit_bytes is None:
        vmem_limit_bytes = _default_vmem_limit()
    if tpix is None:
        tpix = _auto_pixel_tile(C, jnp.dtype(f3.dtype).itemsize, n_labels, vmem_limit_bytes)
    if tpix >= HW:
        tpix = HW                               # full row: block equals array extent
    else:
        tpix = max(128, (tpix // 128) * 128)    # lane alignment
    n_tiles = pl.cdiv(HW, tpix)
    ragged = (HW % tpix) != 0                   # masked in-kernel; no pad copies

    kernel = _make_kernel(C, tpix, HW, use_curriculum, use_kl, ragged)

    logits_spec = pl.BlockSpec((1, C, tpix), lambda n, t: (n, 0, t))
    label_spec = pl.BlockSpec((1, 1, tpix), lambda n, t: (n, 0, t))
    in_specs = [logits_spec, logits_spec, label_spec]
    if use_curriculum:
        in_specs.append(label_spec)

    partials = pl.pallas_call(
        kernel,
        out_shape=jax.ShapeDtypeStruct((N * n_tiles, 8, 128), jnp.float32),
        grid_spec=pltpu.PrefetchScalarGridSpec(
            num_scalar_prefetch=0,
            grid=(N, n_tiles),
            in_specs=in_specs,
            out_specs=pl.BlockSpec((1, 8, 128), lambda n, t: (n * n_tiles + t, 0, 0)),
        ),
        compiler_params=pltpu.CompilerParams(
            dimension_semantics=("parallel", "parallel"),   # both axes independent -> 2 TCs on v7x
            vmem_limit_bytes=int(vmem_limit_bytes),
        ),
    )(*inputs)

    totals = jnp.sum(partials, axis=0)          # (8, 128); each quantity broadcast on its row
    ce_ps_sum, cnt_ps = totals[0, 0], totals[1, 0]
    cons_sum = totals[2, 0]

    loss = ce_ps_sum / cnt_ps                   # CrossEntropy(feat, pseudo), mean over valid
    if use_curriculum:
        ce_gt_sum, cnt_gt = totals[3, 0], totals[4, 0]
        wt = epoch / T * (1.0 - w) + w
        loss = wt * loss + (1.0 - wt) * (ce_gt_sum / cnt_gt)
    if use_kl:
        cons = cons_sum / float(M * C)          # F.kl_div reduction='mean'
    else:
        cons = cons_sum / float(M * C) / float(C)   # softmax_mse_loss
    return loss + alpha * cons


# ----------------------------- pure-JAX reference ----------------------------------
def _reference_forward(feat, mask, teacher_feat, pseudo, epoch=0, *,
                       alpha=1.0, w=0.5, use_curriculum=False, use_kl=True, T=120.0):
    N, C, H, W = feat.shape
    x = feat.reshape(N, C, H * W).astype(jnp.float32)
    y = teacher_feat.reshape(N, C, H * W).astype(jnp.float32)
    ps = pseudo.reshape(N, H * W)
    gt = mask.reshape(N, H * W)
    logq = jax.nn.log_softmax(x, axis=1)

    def ce(labels):
        valid = labels >= 0
        safe = jnp.where(valid, labels, 0)
        picked = jnp.take_along_axis(logq, safe[:, None, :], axis=1)[:, 0, :]
        return jnp.sum(jnp.where(valid, -picked, 0.0)) / jnp.sum(valid)

    loss = ce(ps)
    if use_curriculum:
        wt = epoch / T * (1.0 - w) + w
        loss = wt * loss + (1.0 - wt) * ce(gt)

    p = jax.nn.softmax(y, axis=1)
    if use_kl:
        logp = jax.nn.log_softmax(y, axis=1)
        cons = jnp.sum(p * (logp - logq)) / x.size
    else:
        q = jax.nn.softmax(x, axis=1)
        cons = jnp.mean((q - p) ** 2) / C
    return loss + alpha * cons


# ------------------------------------- demo ----------------------------------------
if __name__ == "__main__":
    key = jax.random.PRNGKey(0)
    k1, k2, k3, k4, k5, k6 = jax.random.split(key, 6)
    N, C, H, W = 2, 4, 16, 16
    feat = jax.random.normal(k1, (N, C, H, W), dtype=jnp.float32)
    teacher = jax.random.normal(k2, (N, C, H, W), dtype=jnp.float32)
    pseudo = jax.random.randint(k3, (N, H, W), 0, C, dtype=jnp.int32)
    mask = jax.random.randint(k4, (N, H, W), 0, C, dtype=jnp.int32)
    # sprinkle some ignore_index = -1 pixels
    pseudo = jnp.where(jax.random.bernoulli(k5, 0.1, (N, H, W)), -1, pseudo)
    mask = jnp.where(jax.random.bernoulli(k6, 0.1, (N, H, W)), -1, mask)

    # 1) Default SegMTLoss path: seg CE + KL consistency; explicit 128-pixel tiles -> (2,2) grid.
    loss = seg_mt_loss(feat, mask, teacher, pseudo, epoch=0, tpix=128)
    jax.block_until_ready(loss)
    ref = _reference_forward(feat, mask, teacher, pseudo, epoch=0)
    assert bool(jnp.isfinite(loss)), loss
    assert jnp.allclose(loss, ref, rtol=1e-3, atol=1e-5), (loss, ref)

    # 2) Curriculum path, auto-sized pixel tile (full-row tile per image).
    loss_c = seg_mt_loss(feat, mask, teacher, pseudo, epoch=30, use_curriculum=True)
    ref_c = _reference_forward(feat, mask, teacher, pseudo, epoch=30, use_curriculum=True)
    assert jnp.allclose(loss_c, ref_c, rtol=1e-3, atol=1e-5), (loss_c, ref_c)

    # 3) Softmax-MSE consistency path (use_kl=False).
    loss_m = seg_mt_loss(feat, mask, teacher, pseudo, epoch=0, use_kl=False, tpix=128)
    ref_m = _reference_forward(feat, mask, teacher, pseudo, epoch=0, use_kl=False)
    assert jnp.allclose(loss_m, ref_m, rtol=1e-3, atol=1e-5), (loss_m, ref_m)

    # 4) Ragged pixel tile (HW=384, tpix=256 -> last tile masked in-kernel, no padding copies)
    #    with bf16 logits (halves HBM traffic; kernel upcasts to f32) and C=5.
    N2, C2, H2, W2 = 2, 5, 16, 24
    f2 = jax.random.normal(k1, (N2, C2, H2, W2), dtype=jnp.bfloat16)
    t2 = jax.random.normal(k2, (N2, C2, H2, W2), dtype=jnp.bfloat16)
    p2 = jax.random.randint(k3, (N2, H2, W2), 0, C2, dtype=jnp.int32)
    m2 = jax.random.randint(k4, (N2, H2, W2), 0, C2, dtype=jnp.int32)
    p2 = jnp.where(jax.random.bernoulli(k5, 0.1, (N2, H2, W2)), -1, p2)
    loss_r = seg_mt_loss(f2, m2, t2, p2, epoch=10, use_curriculum=True, tpix=256)
    ref_r = _reference_forward(f2, m2, t2, p2, epoch=10, use_curriculum=True)
    assert jnp.allclose(loss_r, ref_r, rtol=1e-2, atol=1e-3), (loss_r, ref_r)

    print("KERNEL_OK")
</pallas_src>

<mosaic_0001>
module attributes {stable_mosaic.version = 11 : i64} {
  func.func @kernel(%arg0: i32, %arg1: i32, %arg2: memref<1x4x128xf32, #tpu.memory_space<vmem>>, %arg3: memref<1x4x128xf32, #tpu.memory_space<vmem>>, %arg4: memref<1x1x128xi32, #tpu.memory_space<vmem>>, %arg5: memref<1x8x128xf32, #tpu.memory_space<vmem>>) attributes {dimension_semantics = [#tpu.dimension_semantics<parallel>, #tpu.dimension_semantics<parallel>], iteration_bounds = array<i64: 2, 2>, scalar_prefetch = 0 : i64, scratch_operands = 0 : i64, tpu.core_type = #tpu.core_type<tc>, window_params = [{transform_indices = @transform_0, window_bounds = array<i64: 1, 4, 128>}, {transform_indices = @transform_1, window_bounds = array<i64: 1, 4, 128>}, {transform_indices = @transform_2, window_bounds = array<i64: 1, 1, 128>}, {transform_indices = @transform_3, window_bounds = array<i64: 1, 8, 128>}]} {
    %c0 = arith.constant 0 : index
    %c0_0 = arith.constant 0 : index
    %c0_1 = arith.constant 0 : index
    %0 = vector.load %arg2[%c0, %c0_0, %c0_1] : memref<1x4x128xf32, #tpu.memory_space<vmem>>, vector<1x4x128xf32>
    %1 = vector.shape_cast %0 : vector<1x4x128xf32> to vector<4x128xf32>
    %c0_2 = arith.constant 0 : index
    %c0_3 = arith.constant 0 : index
    %c0_4 = arith.constant 0 : index
    %2 = vector.load %arg3[%c0_2, %c0_3, %c0_4] : memref<1x4x128xf32, #tpu.memory_space<vmem>>, vector<1x4x128xf32>
    %3 = vector.shape_cast %2 : vector<1x4x128xf32> to vector<4x128xf32>
    %c0_5 = arith.constant 0 : index
    %c0_6 = arith.constant 0 : index
    %c0_7 = arith.constant 0 : index
    %4 = vector.load %arg4[%c0_5, %c0_6, %c0_7] : memref<1x1x128xi32, #tpu.memory_space<vmem>>, vector<1x1x128xi32>
    %5 = vector.shape_cast %4 : vector<1x1x128xi32> to vector<1x128xi32>
    %cst = arith.constant dense<0xFF800000> : vector<128xf32>
    %6 = vector.multi_reduction <maximumf>, %1, %cst [0] : vector<4x128xf32> to vector<128xf32>
    %7 = vector.shape_cast %6 : vector<128xf32> to vector<1x128xf32>
    %8 = vector.broadcast %7 : vector<1x128xf32> to vector<4x128xf32>
    %9 = arith.subf %1, %8 : vector<4x128xf32>
    %10 = math.exp %9 : vector<4x128xf32>
    %cst_8 = arith.constant dense<0.000000e+00> : vector<128xf32>
    %11 = vector.multi_reduction <add>, %10, %cst_8 [0] : vector<4x128xf32> to vector<128xf32>
    %12 = vector.shape_cast %11 : vector<128xf32> to vector<1x128xf32>
    %13 = math.log %12 : vector<1x128xf32>
    %14 = tpu.iota {dimensions = array<i32: 0>} : vector<4x128xi32>
    %15 = vector.broadcast %5 : vector<1x128xi32> to vector<4x128xi32>
    %16 = arith.cmpi eq, %14, %15 : vector<4x128xi32>
    %cst_9 = arith.constant 0.000000e+00 : f32
    %17 = vector.broadcast %cst_9 : f32 to vector<4x128xf32>
    %18 = arith.select %16, %9, %17 : vector<4x128xi1>, vector<4x128xf32>
    %cst_10 = arith.constant dense<0.000000e+00> : vector<128xf32>
    %19 = vector.multi_reduction <add>, %18, %cst_10 [0] : vector<4x128xf32> to vector<128xf32>
    %20 = vector.shape_cast %19 : vector<128xf32> to vector<1x128xf32>
    %c0_i32 = arith.constant 0 : i32
    %21 = vector.broadcast %c0_i32 : i32 to vector<1x128xi32>
    %22 = arith.cmpi sge, %5, %21 : vector<1x128xi32>
    %23 = arith.subf %13, %20 : vector<1x128xf32>
    %cst_11 = arith.constant 0.000000e+00 : f32
    %24 = vector.broadcast %cst_11 : f32 to vector<1x128xf32>
    %25 = arith.select %22, %23, %24 : vector<1x128xi1>, vector<1x128xf32>
    %26 = vector.shape_cast %25 : vector<1x128xf32> to vector<1x1x128xf32>
    %cst_12 = arith.constant dense<0.000000e+00> : vector<1xf32>
    %27 = vector.multi_reduction <add>, %26, %cst_12 [1, 2] : vector<1x1x128xf32> to vector<1xf32>
    %28 = vector.shape_cast %27 : vector<1xf32> to vector<1x1x1xf32>
    %29 = vector.extract %28[0, 0, 0] : f32 from vector<1x1x1xf32>
    %30 = arith.extui %22 : vector<1x128xi1> to vector<1x128xi32>
    %31 = arith.sitofp %30 : vector<1x128xi32> to vector<1x128xf32>
    %32 = vector.shape_cast %31 : vector<1x128xf32> to vector<1x1x128xf32>
    %cst_13 = arith.constant dense<0.000000e+00> : vector<1xf32>
    %33 = vector.multi_reduction <add>, %32, %cst_13 [1, 2] : vector<1x1x128xf32> to vector<1xf32>
    %34 = vector.shape_cast %33 : vector<1xf32> to vector<1x1x1xf32>
    %35 = vector.extract %34[0, 0, 0] : f32 from vector<1x1x1xf32>
    %cst_14 = arith.constant dense<0xFF800000> : vector<128xf32>
    %36 = vector.multi_reduction <maximumf>, %3, %cst_14 [0] : vector<4x128xf32> to vector<128xf32>
    %37 = vector.shape_cast %36 : vector<128xf32> to vector<1x128xf32>
    %38 = vector.broadcast %37 : vector<1x128xf32> to vector<4x128xf32>
    %39 = arith.subf %3, %38 : vector<4x128xf32>
    %40 = math.exp %39 : vector<4x128xf32>
    %cst_15 = arith.constant dense<0.000000e+00> : vector<128xf32>
    %41 = vector.multi_reduction <add>, %40, %cst_15 [0] : vector<4x128xf32> to vector<128xf32>
    %42 = vector.shape_cast %41 : vector<128xf32> to vector<1x128xf32>
    %43 = arith.subf %39, %9 : vector<4x128xf32>
    %44 = arith.mulf %40, %43 : vector<4x128xf32>
    %cst_16 = arith.constant dense<0.000000e+00> : vector<128xf32>
    %45 = vector.multi_reduction <add>, %44, %cst_16 [0] : vector<4x128xf32> to vector<128xf32>
    %46 = vector.shape_cast %45 : vector<128xf32> to vector<1x128xf32>
    %47 = arith.divf %46, %42 : vector<1x128xf32>
    %48 = math.log %42 : vector<1x128xf32>
    %49 = arith.subf %13, %48 : vector<1x128xf32>
    %50 = arith.addf %47, %49 : vector<1x128xf32>
    %51 = vector.shape_cast %50 : vector<1x128xf32> to vector<1x1x128xf32>
    %cst_17 = arith.constant dense<0.000000e+00> : vector<1xf32>
    %52 = vector.multi_reduction <add>, %51, %cst_17 [1, 2] : vector<1x1x128xf32> to vector<1xf32>
    %53 = vector.shape_cast %52 : vector<1xf32> to vector<1x1x1xf32>
    %54 = vector.extract %53[0, 0, 0] : f32 from vector<1x1x1xf32>
    %55 = tpu.iota {dimensions = array<i32: 0>} : vector<8x128xi32>
    %c0_i32_18 = arith.constant 0 : i32
    %56 = vector.broadcast %c0_i32_18 : i32 to vector<8x128xi32>
    %57 = arith.cmpi eq, %55, %56 : vector<8x128xi32>
    %cst_19 = arith.constant 0.000000e+00 : f32
    %58 = vector.broadcast %29 : f32 to vector<8x128xf32>
    %59 = vector.broadcast %cst_19 : f32 to vector<8x128xf32>
    %60 = arith.select %57, %58, %59 : vector<8x128xi1>, vector<8x128xf32>
    %c1_i32 = arith.constant 1 : i32
    %61 = vector.broadcast %c1_i32 : i32 to vector<8x128xi32>
    %62 = arith.cmpi eq, %55, %61 : vector<8x128xi32>
    %63 = vector.broadcast %35 : f32 to vector<8x128xf32>
    %64 = arith.select %62, %63, %60 : vector<8x128xi1>, vector<8x128xf32>
    %c2_i32 = arith.constant 2 : i32
    %65 = vector.broadcast %c2_i32 : i32 to vector<8x128xi32>
    %66 = arith.cmpi eq, %55, %65 : vector<8x128xi32>
    %67 = vector.broadcast %54 : f32 to vector<8x128xf32>
    %68 = arith.select %66, %67, %64 : vector<8x128xi1>, vector<8x128xf32>
    %c0_20 = arith.constant 0 : index
    %c0_21 = arith.constant 0 : index
    %c0_22 = arith.constant 0 : index
    %69 = vector.load %arg5[%c0_20, %c0_21, %c0_22] : memref<1x8x128xf32, #tpu.memory_space<vmem>>, vector<1x8x128xf32>
    %70 = vector.shape_cast %69 : vector<1x8x128xf32> to vector<8x128xf32>
    %71 = vector.shape_cast %68 : vector<8x128xf32> to vector<1x8x128xf32>
    tpu.vector_store %arg5[%c0_20, %c0_21, %c0_22], %71 {strides = array<i32>} : memref<1x8x128xf32, #tpu.memory_space<vmem>>, vector<1x8x128xf32>,
    return
  }
  func.func @transform_0(%arg0: i32, %arg1: i32) -> (i32, i32, i32) {
    %c0_i32 = arith.constant 0 : i32
    %c0_i32_0 = arith.constant 0 : i32
    return %arg0, %c0_i32, %arg1 : i32, i32, i32
  }
  func.func @transform_1(%arg0: i32, %arg1: i32) -> (i32, i32, i32) {
    %c0_i32 = arith.constant 0 : i32
    %c0_i32_0 = arith.constant 0 : i32
    return %arg0, %c0_i32, %arg1 : i32, i32, i32
  }
  func.func @transform_2(%arg0: i32, %arg1: i32) -> (i32, i32, i32) {
    %c0_i32 = arith.constant 0 : i32
    %c0_i32_0 = arith.constant 0 : i32
    return %arg0, %c0_i32, %arg1 : i32, i32, i32
  }
  func.func @transform_3(%arg0: i32, %arg1: i32) -> (i32, i32, i32) {
    %c2_i32 = arith.constant 2 : i32
    %0 = arith.muli %arg0, %c2_i32 : i32
    %1 = arith.addi %0, %arg1 : i32
    %c0_i32 = arith.constant 0 : i32
    %c0_i32_0 = arith.constant 0 : i32
    %c0_i32_1 = arith.constant 0 : i32
    return %1, %c0_i32, %c0_i32_0 : i32, i32, i32
  }
}

</mosaic_0001>

<bundles_post_ra>
// kernel: tpu_custom_call.1
= control target key start
LH: loop header
LB: loop body
LE: loop exit
PB: predicated region body
PF: predicated region fallthrough
CT: control target
= control target key end

     0   :  { %s1191_s0 = inlined_call_operand.hbm [shape: f32[2,4,256], index: 0, kind: input, shape index: {}]   ;;  %s1192_s1 = inlined_call_operand.hbm [shape: f32[2,4,256], index: 1, kind: input, shape index: {}]   ;;  %s1193_s2 = inlined_call_operand.vmem [shape: s32[2,1,256], index: 2, kind: input, shape index: {}]   ;;  %s1194_s3 = inlined_call_operand.hbm [shape: f32[4,8,128], index: 3, kind: output, shape index: {}]  }
   0x1   :  { %1202 = sst [smem:[#allocation14_spill]] %s1191_s0 }
   0x2   :  { %8 = vsyncpa [#allocation3], 0 }
   0x3   :  { %10 = vsyncpa [#allocation3 + $0x1], 0 }
   0x4   :  { %11 = vsyncpa [#allocation6], 0 }
   0x5   :  { %13 = vsyncpa [#allocation6 + $0x1], 0 }
   0x6   :  { %14 = vsyncpa [#allocation4], 0 }
   0x7   :  { %16 = vsyncpa [#allocation4 + $0x1], 0  ;;  %s893_s12 = smov 0   ;;  %s895_s13 = smov 0  }
   0x8   :  { %s897_s14 = smov 0   ;;  %s899_s15 = smov 0  }
   0x9   :  { %s901_s16 = smov 0   ;;  %s903_s17 = smov 0  }
   0xa   :  { %s905_s18 = smov 0   ;;  %s907_s19 = smov 0  }
   0xb   :  { %s909_s20 = smov 0   ;;  %s911_s21 = smov 0  }
   0xc   :  { %s913_s22 = smov 0  }
   0xd LB: > { %1203 = sst [smem:[#allocation11_spill]] %s863_s21  ;;  %s534_s23 = sadd.s32 4294967295, %s867_s22   ;;  %s867_s22 = sphi %s913_s22, %s22_s22   ;;  %s863_s21 = sphi %s911_s21, %s1225_s21   ;;  %s859_s20 = sphi %s909_s20, %s1233_s20   ;;  %s855_s19 = sphi %s907_s19, %s1223_s19   ;;  %s851_s18 = sphi %s905_s18, %s1232_s18   ;;  %s847_s17 = sphi %s903_s17, %s1231_s17   ;;  %s843_s16 = sphi %s901_s16, %s1230_s16   ;;  %s839_s15 = sphi %s899_s15, %s1229_s15   ;;  %s835_s14 = sphi %s897_s14, %s1228_s14   ;;  %s831_s13 = sphi %s895_s13, %s1227_s13   ;;  %s827_s12 = sphi %s893_s12, %s1226_s12  }
   0xe   : > { %s31_s25 = sadd.s32 1, %s859_s20  ;;  %s34_s26 = sadd.s32 1, %s863_s21 }
   0xf   : > { %p32_p0 = scmp.ge.s32.totalorder %s31_s25, 2  ;;  %s43_s27 = sadd.s32 1, %s847_s17 }
  0x10   : > { %p50_p1 = scmp.ne.s32.totalorder %s847_s17, %s843_s16  ;;  %p51_p2 = scmp.eq.s32.totalorder %s867_s22, 0 }
  0x11   : > { %s1235_s25 = smov (%p32_p0, %s31_s25), 0  ;;  %s1237_s26 = smov (!%p32_p0, %s34_s26), %s863_s21 }
  0x12   : > { %1204 = sst [smem:[#allocation12_spill]] %s1235_s25  ;;  %s39_s28 = ssub.s32 %s859_s20, %s1235_s25 }
  0x13   : > { %p959_p3 = por %p51_p2, %p50_p1  ;;  %p36_p4 = scmp.ge.s32.totalorder %s1237_s26, 2 }
  0x14   : > { %p56_p5 = scmp.ne.s32.totalorder %s843_s16, %s839_s15  ;;  %p57_p6 = scmp.eq.s32.totalorder %s534_s23, 0 }
  0x15   : > { %s536_s30 = sshll.u32 %s863_s21, 1  ;;  %s1239_s26 = smov (%p36_p4, %s1237_s26), 0 }
  0x16   : > { %1206 = sst [smem:[#allocation13_spill]] %s1239_s26  ;;  %p969_p7 = por %p57_p6, %p56_p5 }
  0x17   : > { %s974_s5 = sadd.s32 %s859_s20, %s536_s30  ;;  %s38_s6 = ssub.s32 %s863_s21, %s1239_s26 }
  0x18   : > { %s1207_s4 = scalar_select %p969_p7, 1, 0 }
  0x19   : > { %s537_s7 = sshll.u32 %s1239_s26, 1  ;;  %s40_s8 = sor.u32 %s39_s28, %s38_s6 }
  0x1a   : > { %s125_s9 = sadd.s32 %s537_s7, %s1235_s25  ;;  %p41_p8 = scmp.eq.s32.totalorder %s40_s8, 0 }
  0x1b   : > { %s126_s10 = ssub.s32 %s974_s5, %s125_s9  ;;  %s129_s11 = sadd.s32 1, %s835_s14 }
  0x1c   : > { %p127_p9 = scmp.eq.s32.totalorder %s126_s10, 0  ;;  %p139_p10 = scmp.ne.s32.totalorder %s835_s14, %s831_s13 }
  0x1d   : > { %s983_s15 = scalar_select %p41_p8, %s847_s17, %s43_s27  }
  0x1e   : > { %s986_s24 = scalar_select %p127_p9, %s835_s14, %s129_s11  }
  0x1f   : > { %p140_p11 = scmp.eq.s32.totalorder %s534_s23, 3  ;;  %p145_p12 = scmp.ne.s32.totalorder %s831_s13, %s827_s12 }
  0x20   : > { %s1208_s30 = sadd.s32 4294967294, %s867_s22   ;;  %p580_p2 = scmp.lt.s32.totalorder %s867_s22, 4 }
  0x21   : > { %p146_p13 = scmp.eq.s32.totalorder %s1208_s30, 3  ;;  %p996_p0 = por %p140_p11, %p139_p10 }
  0x22   : > { %s1006_s27 = sand.u32 1, %s847_s17   ;;  %s1197_s7 = sshll.u32 %s974_s5, 6 }
  0x23   : > { %s1209_s28 = scalar_select %p996_p0, 1, 0 }
  0x24   : > { %p1000_p1 = por %p146_p13, %p145_p12  ;;  %s1196_s8 = sshll.u32 %s1006_s27, 2 }
  0x25   : > { %s1211_s0 = sld [smem:[#allocation14_spill]]  ;;  %s170_s11 = scalar_lea.vmem [#allocation2], %s1196_s8 }
  0x26   : > { %s1210_s6 = scalar_select %p1000_p1, 1, 0 }
  0x27   : > { %s179_s30 = sshll.u32 %s170_s11, 4  ;;  %p1021_p4 = pnand %p580_p2, %p959_p3  ;;  %s1025_s30 = int_to_ptr.vmem [resolvable:$true] %s179_s30 }
  0x28   : > { %s167_s23 = scalar_lea.sflag [#allocation3], %s1006_s27 }
  0x29   : > { %p683_p9 = pneg %p1021_p4 }
  0x2b   : > { %s1015_s10 = scalar_lea.hbm %s1211_s0, %s1197_s7  ;;  %s686_s8 = scalar_lea.hbm %s1211_s0, 256 }
  0x2c   : > { %s681_s9 = scalar_lea.hbm %s1015_s10, 64  ;;  %p687_p3 = scmp.lt.u32.totalorder %s1015_s10, %s1211_s0 }
  0x2d   : > { %p682_p8 = scmp.ne.s32.totalorder %s1015_s10, %s681_s9  ;;  %p688_p12 = scmp.lt.u32.totalorder %s686_s8, %s681_s9 }
  0x2e   : > { %p690_p2 = scmp.lt.u32.totalorder %s681_s9, %s1015_s10 }
  0x2f   : > { %p684_p10 = pnand %p683_p9, %p682_p8  ;;  %p689_p13 = por %p688_p12, %p687_p3 }
  0x31   : > { %p685_p11 = pneg %p684_p10  ;;  %p691_p5 = por %p690_p2, %p689_p13 }
  0x33   : > { %p692_p6 = pnand %p691_p5, %p685_p11 }
  0x35   : > { %695 = shalt.err (!%p692_p6)
}
  0x36   : > { %s696_s21 = scalar_lea.vmem %s1025_s30, 64  ;;  %s869_s29 = smov [#allocation2]  }
  0x37   : > { %p697_p8 = scmp.ne.s32.totalorder %s1025_s30, %s696_s21  ;;  %s701_s11 = sshll.u32 %s869_s29, 4  ;;  %s702_s11 = int_to_ptr.vmem [resolvable:$false] %s701_s11 }
  0x38   : > { %s703_s25 = scalar_lea.vmem %s702_s11, 128  ;;  %p704_p0 = scmp.lt.s32.totalorder %s1025_s30, %s702_s11 }
  0x39   : > { %p699_p10 = pnand %p697_p8, %p683_p9  ;;  %p705_p3 = scmp.lt.s32.totalorder %s703_s25, %s696_s21 }
  0x3b   : > { %p700_p1 = pneg %p699_p10  ;;  %p706_p12 = por %p705_p3, %p704_p0 }
  0x3d   : > { %p707_p13 = pnand %p706_p12, %p700_p1 }
  0x3f   : > { %710 = shalt.err (!%p707_p13)
}
  0x40   : > { %572 = dma.hbm_to_vmem [thread:$0]  (!%p1021_p4), %s1015_s10, 64, %s1025_s30, %s167_s23  }
  0x41   : > { %p1213_p5 = scmp.lt.s32.totalorder %s867_s22, 5  ;;  %p1214_p6 = scmp.ge.s32.totalorder %s867_s22, 1 }
  0x42   : > { %s1216_s21 = sshll.u32 %s974_s5, 6  ;;  %s1217_s11 = sshll.u32 %s1006_s27, 2 }
  0x43   : > { %p1059_p11 = pnand %p1214_p6, %p1213_p5  ;;  %s1068_s29 = scalar_lea.hbm %s1192_s1, %s1216_s21 }
  0x44   : > { %s190_s25 = scalar_lea.vmem [#allocation5], %s1217_s11  ;;  %s187_s10 = scalar_lea.sflag [#allocation6], %s1006_s27 }
  0x45   : > { %s1215_s7 = scalar_select %p1059_p11, 1, 0 }
  0x46   : > { %s199_s0 = sshll.u32 %s190_s25, 4  ;;  %s711_s30 = scalar_lea.hbm %s1068_s29, 64  ;;  %s200_s0 = int_to_ptr.vmem [resolvable:$true] %s199_s0 }
  0x47   : > { %p712_p0 = scmp.ne.s32.totalorder %s1068_s29, %s711_s30  ;;  %s716_s21 = scalar_lea.hbm %s1192_s1, 256 }
  0x48   : > { %p717_p8 = scmp.lt.u32.totalorder %s1068_s29, %s1192_s1  ;;  %p718_p10 = scmp.lt.u32.totalorder %s716_s21, %s711_s30 }
  0x49   : > { %p714_p1 = pnand %p712_p0, %p683_p9  ;;  %p720_p12 = scmp.lt.u32.totalorder %s711_s30, %s1068_s29 }
  0x4a   : > { %p719_p3 = por %p718_p10, %p717_p8 }
  0x4b   : > { %p715_p2 = pneg %p714_p1 }
  0x4c   : > { %p721_p13 = por %p720_p12, %p719_p3 }
  0x4e   : > { %p722_p5 = pnand %p721_p13, %p715_p2 }
  0x50   : > { %725 = shalt.err (!%p722_p5)
}
  0x51   : > { %s726_s27 = scalar_lea.vmem %s200_s0, 64  ;;  %s870_s11 = smov [#allocation5]  }
  0x52   : > { %p727_p6 = scmp.ne.s32.totalorder %s200_s0, %s726_s27  ;;  %s731_s25 = sshll.u32 %s870_s11, 4  ;;  %s732_s25 = int_to_ptr.vmem [resolvable:$false] %s731_s25 }
  0x53   : > { %s733_s5 = scalar_lea.vmem %s732_s25, 128  ;;  %p734_p7 = scmp.lt.s32.totalorder %s200_s0, %s732_s25 }
  0x54   : > { %p729_p0 = pnand %p727_p6, %p683_p9  ;;  %p735_p11 = scmp.lt.s32.totalorder %s733_s5, %s726_s27 }
  0x56   : > { %p730_p1 = pneg %p729_p0  ;;  %p736_p8 = por %p735_p11, %p734_p7 }
  0x58   : > { %p737_p10 = pnand %p736_p8, %p730_p1 }
  0x5a   : > { %740 = shalt.err (!%p737_p10)
}
  0x5b   : > { %575 = dma.hbm_to_vmem [thread:$0]  (!%p1021_p4), %s1068_s29, 64, %s200_s0, %s187_s10  }
  0x5c   : > { %p1218_p2 = scmp.ne.s32.totalorder %s1215_s7, 0 }
  0x5d   : > { %s220_s30 = sand.u32 (!%p1218_p2), 1, %s843_s16   ;;  %p1219_p9 = scmp.ne.s32.totalorder (!%p1218_p2), %s1207_s4, 0 }
  0x5e   : > { %218 = sbr.rel (%p1218_p2) target bundleno = 388 (0x184), region = 32  ;;  %s547_s23 = sshll.u32 (!%p1218_p2), %s220_s30, 2 }
  0x5f   : > { %s221_s21 = scalar_lea.sflag (!%p1218_p2), [#allocation3], %s220_s30  ;;  %s224_s8 = scalar_lea.vmem (!%p1218_p2), [#allocation2], %s547_s23 }
  0x65   : > { %814 = dma.done.wait (%p1219_p9), %s221_s21, 64  }
  0x66   : > { %816 = vsyncadd (%p1219_p9), %s221_s21, 4294967232  ;;  %s230_s9 = scalar_lea.sflag [#allocation6], %s220_s30  ;;  %s233_s27 = scalar_lea.vmem [#allocation5], %s547_s23 }
  0x67   : > { %818 = dma.done.wait (%p1219_p9), %s230_s9, 64  }
  0x68   : > { %820 = vsyncadd (%p1219_p9), %s230_s9, 4294967232  ;;  %p268_p7 = scmp.lt.s32.totalorder %s855_s19, 1  ;;  %vm280_vm0 = vcmask 1043456   ;;  %v277_v0 = vld [vmem:[%s224_s8] sm:$0xf]  ;;  %p270_p4 = scmp.lt.s32.totalorder %s851_s18, 1  ;;  %v300_v9 = vlaneseq }
  0x69   : > { %v278_v1 = vld [vmem:[%s233_s27] sm:$0xf]  ;;  %v281_v2 = vsel %vm280_vm0, %v277_v0, -inf  ;;  %vm318_vm3 = vcmask 1040384   ;;  %s265_s25 = sand.u32 1, %s831_s13   ;;  %s553_s30 = sshll.u32 %s855_s19, 1 }
  0x6a   : > { %v341_v3 = vsel %vm280_vm0, %v278_v1, -inf  ;;  %s269_s0 = scalar_select %p268_p7, %s855_s19, 1  ;;  %v282_v4 = vrot.slane %v281_v2, 4  ;;  %v1109_v14 = vshrl.u32 %v300_v9, 7 }
  0x6b   : > { %v342_v5 = vrot.slane %v341_v3, 4  ;;  %s271_s26 = scalar_select %p270_p4, %s851_s18, 1 }
  0x6c   : > { %v283_v6 = vmax.f32 %v281_v2, %v282_v4  ;;  %s550_s4 = sshll.u32 %s269_s0, 1  ;;  %v304_v19 = vsub.s32 0, %v1109_v14  ;;  %s549_s5 = sshll.u32 %s265_s25, 3  ;;  %vm383_vm4 = vcmp.eq.s32.totalorder %v1109_v14, 0  ;;  %vm386_vm5 = vcmp.eq.s32.totalorder %v1109_v14, 1 }
  0x6d   : > { %v343_v7 = vmax.f32 %v341_v3, %v342_v5  ;;  %s273_s7 = sadd.s32 %s550_s4, %s271_s26  ;;  %v871_v3 = vmov 0.0   ;;  %s402_s21 = sadd.s32 %s851_s18, %s553_s30  ;;  %vm389_vm6 = vcmp.eq.s32.totalorder %v1109_v14, 2 }
  0x6e   : > { %v284_v8 = vrot.slane %v283_v6, 2  ;;  %s274_s11 = scalar_lea.vmem %s1193_s2, %s273_s7  ;;  %s554_s8 = sshll.u32 %s402_s21, 7 }
  0x6f   : > { %v344_v10 = vrot.slane %v343_v7, 2  ;;  %v279_v21 = vld [vmem:[%s274_s11] sm:$0x1]  ;;  %s267_s9 = scalar_lea.vmem [#allocation7], %s549_s5  ;;  %s1129_s18 = scalar_lea.hbm %s1194_s3, %s554_s8 }
  0x70   : > { %v285_v11 = vmax.f32 %v283_v6, %v284_v8  ;;  %v305_v24 = vrot.slane %v279_v21, %v304_v19  ;;  %vm315_vm2 = vcmp.ge.s32.totalorder %v279_v21, 0  ;;  %s409_s27 = sshll.u32 %s267_s9, 4  ;;  %s394_s7 = scalar_lea.sflag [#allocation4], %s265_s25  ;;  %s1131_s27 = int_to_ptr.vmem [resolvable:$true] %s409_s27 }
  0x71   : > { %v345_v12 = vmax.f32 %v343_v7, %v344_v10  ;;  %v551_v4 = vsel %vm315_vm2, 1.0, %v871_v3  ;;  %s741_s29 = scalar_lea.vmem %s1131_s27, 128  ;;  %p1220_p3 = scmp.ne.s32.totalorder %s1209_s28, 0 }
  0x72   : > { %v286_v13 = vrot.slane %v285_v11, 1  ;;  %vm306_vm1 = vcmp.eq.s32.totalorder %v1109_v14, %v305_v24  ;;  %v331_v7 = vsel %vm318_vm3, %v551_v4, 0.0  ;;  %p742_p11 = scmp.ne.s32.totalorder %s1131_s27, %s741_s29  ;;  %s872_s10 = smov [#allocation7]  }
  0x73   : > { %v346_v15 = vrot.slane %v345_v12, 1  ;;  %s745_s11 = sshll.u32 %s872_s10, 4  ;;  %s746_s11 = int_to_ptr.vmem [resolvable:$false] %s745_s11 }
  0x74   : > { %v287_v16 = vmax.f32 %v285_v11, %v286_v13  ;;  %p743_p12 = pnand %p742_p11, %p1220_p3  ;;  %s747_s5 = scalar_lea.vmem %s746_s11, 256 }
  0x75   : > { %v347_v17 = vmax.f32 %v345_v12, %v346_v15  ;;  %p748_p5 = scmp.lt.s32.totalorder %s1131_s27, %s746_s11  ;;  %p749_p6 = scmp.lt.s32.totalorder %s747_s5, %s741_s29 }
  0x76   : > { %v288_v18 = vsub.f32 %v277_v0, %v287_v16  ;;  %p744_p13 = pneg %p743_p12 }
  0x77   : > { %v348_v20 = vsub.f32 %v278_v1, %v347_v17  ;;  %p750_p0 = por %p749_p6, %p748_p5 }
  0x78   : > { %v289_v22 = vmul.f32 1.442695, %v288_v18  ;;  %v307_v25 = vsel %vm306_vm1, %v288_v18, 0.0 }
  0x79   : > { %v349_v23 = vmul.f32 1.442695, %v348_v20  ;;  %v358_v26 = vsub.f32 %v348_v20, %v288_v18  ;;  %v308_v28 = vsel %vm280_vm0, %v307_v25, 0.0  ;;  %p751_p1 = pnand %p750_p0, %p744_p13 }
  0x7a   : > { %671 = vpow2.f32 %v289_v22  ;;  %v309_v34 = vrot.slane %v308_v28, 4 }
  0x7b   : > { %673 = vpow2.f32 %v349_v23 }
  0x7c   : > { %v310_v41 = vadd.f32 %v309_v34, %v308_v28 }
  0x7e   : > { %v311_v47 = vrot.slane %v310_v41, 2 }
  0x80   : > { %v312_v52 = vadd.f32 %v311_v47, %v310_v41 }
  0x82   : > { %v313_v54 = vrot.slane %v312_v52, 1 }
  0x84   : > { %v672_v27 = vpop.eup %671  ;;  %v314_v56 = vadd.f32 %v313_v54, %v312_v52 }
  0x85   : > { %v674_v29 = vpop.eup %673  ;;  %v291_v30 = vsel %vm280_vm0, %v672_v27, 0.0 }
  0x86   : > { %v292_v31 = vrot.slane %v291_v30, 4  ;;  %v351_v32 = vsel %vm280_vm0, %v674_v29, 0.0  ;;  %v359_v33 = vmul.f32 %v674_v29, %v358_v26 }
  0x87   : > { %v352_v35 = vrot.slane %v351_v32, 4 }
  0x88   : > { %v293_v36 = vadd.f32 %v292_v31, %v291_v30  ;;  %v360_v37 = vsel %vm280_vm0, %v359_v33, 0.0 }
  0x89   : > { %v353_v38 = vadd.f32 %v352_v35, %v351_v32  ;;  %v361_v39 = vrot.slane %v360_v37, 4 }
  0x8a   : > { %v294_v40 = vrot.slane %v293_v36, 2 }
  0x8b   : > { %v354_v42 = vrot.slane %v353_v38, 2  ;;  %v362_v43 = vadd.f32 %v361_v39, %v360_v37 }
  0x8c   : > { %v295_v44 = vadd.f32 %v294_v40, %v293_v36 }
  0x8d   : > { %v355_v45 = vadd.f32 %v354_v42, %v353_v38  ;;  %v363_v49 = vrot.slane %v362_v43, 2 }
  0x8e   : > { %v296_v46 = vrot.slane %v295_v44, 1 }
  0x8f   : > { %v356_v48 = vrot.slane %v355_v45, 1  ;;  %v364_v53 = vadd.f32 %v363_v49, %v362_v43 }
  0x90   : > { %v297_v50 = vadd.f32 %v296_v46, %v295_v44 }
  0x91   : > { %v357_v51 = vadd.f32 %v356_v48, %v355_v45  ;;  %v365_v55 = vrot.slane %v364_v53, 1 }
  0x92   : > { %675 = vlog2.f32 %v297_v50 }
  0x93   : > { %677 = vrcp.f32 %v357_v51  ;;  %v366_v57 = vadd.f32 %v365_v55, %v364_v53 }
  0x94   : > { %679 = vlog2.f32 %v357_v51 }
  0x9c   : > { %v676_v58 = vpop.eup %675 }
  0x9d   : > { %v678_v59 = vpop.eup %677  ;;  %v299_v60 = vmul.f32 0.6931472, %v676_v58 }
  0x9e   : > { %v680_v61 = vpop.eup %679  ;;  %v368_v63 = vmul.f32 %v678_v59, %v366_v57 }
  0x9f   : > { %v316_v62 = vsub.f32 %v299_v60, %v314_v56  ;;  %v370_v0 = vmul.f32 0.6931472, %v680_v61 }
  0xa1   : > { %v317_v1 = vsel %vm315_vm2, %v316_v62, 0.0  ;;  %v371_v2 = vsub.f32 %v299_v60, %v370_v0 }
  0xa2   : > { %v319_v5 = vsel %vm318_vm3, %v317_v1, 0.0 }
  0xa3   : > { %320 = vadd.xlane.f32.xlu0 %v319_v5  ;;  %v372_v6 = vadd.f32 %v371_v2, %v368_v63 }
  0xa5   : > { %v373_v8 = vsel %vm318_vm3, %v372_v6, 0.0 }
  0xa6   : > { %374 = vadd.xlane.f32.xlu1 %v373_v8 }
  0xa7   : > { %332 = vadd.xlane.f32.xlu0 %v331_v7 }
 0x130   : > { %v321_v9 = vpop.xlane.xlu0 %320 }
 0x131   : > { %v322_v10 = vrot.slane %v321_v9, 4 }
 0x133   : > { %v323_v11 = vadd.f32 %v322_v10, %v321_v9  ;;  %v375_v12 = vpop.xlane.xlu1 %374 }
 0x134   : > { %v376_v13 = vrot.slane %v375_v12, 4  ;;  %v333_v15 = vpop.xlane.xlu0 %332 }
 0x135   : > { %v324_v16 = vrot.slane %v323_v11, 2  ;;  %v334_v17 = vrot.slane %v333_v15, 4 }
 0x136   : > { %v377_v18 = vadd.f32 %v376_v13, %v375_v12 }
 0x137   : > { %v335_v19 = vadd.f32 %v334_v17, %v333_v15  ;;  %v325_v20 = vadd.f32 %v324_v16, %v323_v11 }
 0x138   : > { %v378_v21 = vrot.slane %v377_v18, 2 }
 0x139   : > { %v336_v22 = vrot.slane %v335_v19, 2  ;;  %v326_v23 = vrot.slane %v325_v20, 1 }
 0x13a   : > { %v379_v24 = vadd.f32 %v378_v21, %v377_v18 }
 0x13b   : > { %v337_v25 = vadd.f32 %v336_v22, %v335_v19  ;;  %v327_v26 = vadd.f32 %v326_v23, %v325_v20 }
 0x13c   : > { %v380_v27 = vrot.slane %v379_v24, 1 }
 0x13d   : > { %557 = vpush %v327_v26  ;;  %v338_v28 = vrot.slane %v337_v25, 1 }
 0x13e   : > { %v381_v30 = vadd.f32 %v380_v27, %v379_v24 }
 0x13f   : > { %v339_v29 = vadd.f32 %v338_v28, %v337_v25 }
 0x141   : > { %559 = vpush %v339_v29 }
 0x142   : > { %561 = vpush %v381_v30 }
 0x16e   : > { %s558_s23 = spop %557 }
 0x16f   : > { %v384_v31 = vstv %s558_s23 }
 0x170   : > { %v385_v32 = vsel %vm383_vm4, %v384_v31, 0.0 }
 0x172   : > { %s560_s0 = spop %559 }
 0x173   : > { %v387_v33 = vstv %s560_s0  ;;  %s562_s26 = spop %561 }
 0x174   : > { %v388_v34 = vsel %vm386_vm5, %v387_v33, %v385_v32  ;;  %v390_v35 = vstv %s562_s26 }
 0x175   : > { %v391_v36 = vsel %vm389_vm6, %v390_v35, %v388_v34 }
 0x176   : > { %392 = vst [vmem:[%s267_s9] sm:$0xff] %v391_v36 }
 0x177   : > { %754 = shalt.err (!%p751_p1)
}
 0x178   : > { %s755_s25 = scalar_lea.hbm %s1129_s18, 128  ;;  %s759_s21 = scalar_lea.hbm %s1194_s3, 512 }
 0x179   : > { %p756_p8 = scmp.ne.s32.totalorder %s1129_s18, %s755_s25  ;;  %p760_p9 = scmp.lt.u32.totalorder %s1129_s18, %s1194_s3 }
 0x17a   : > { %p761_p7 = scmp.lt.u32.totalorder %s759_s21, %s755_s25  ;;  %p763_p11 = scmp.lt.u32.totalorder %s755_s25, %s1129_s18 }
 0x17b   : > { %p757_p10 = pnand %p756_p8, %p1220_p3 }
 0x17c   : > { %p762_p4 = por %p761_p7, %p760_p9 }
 0x17d   : > { %p758_p2 = pneg %p757_p10 }
 0x17e   : > { %p764_p12 = por %p763_p11, %p762_p4 }
 0x180   : > { %p765_p13 = pnand %p764_p12, %p758_p2 }
 0x182   : > { %768 = shalt.err (!%p765_p13)
}
 0x183   : > { %567 = dma.vmem_to_hbm [thread:$0]  (%p1220_p3), %s1131_s27, 128, %s1129_s18, %s394_s7  }
 0x184 PF: > { %p581_p5 = scmp.ge.s32.totalorder %s867_s22, 2  ;;  %s421_s0 = sand.u32 1, %s827_s12  }
 0x185   : > { %p1221_p6 = scmp.ne.s32.totalorder %s1210_s6, 0  ;;  %s422_s26 = scalar_lea.sflag [#allocation4], %s421_s0 }
 0x187   : > { %p577_p0 = pnand %p581_p5, %p1221_p6 }
 0x189   : > { %822 = dma.done.wait (!%p577_p0), %s422_s26, 128  }
 0x18a   : > { %824 = vsyncadd (!%p577_p0), %s422_s26, 4294967168  ;;  %s22_s22 = sadd.s32 1, %s867_s22   ;;  %s1222_s28 = smov %s983_s15 }
 0x18b   : > { %p19_p1 = scmp.ge.s32.totalorder %s22_s22, 6   ;;  %s1223_s19 = sld [smem:[#allocation11_spill]] }
 0x18c   : > { %s1224_s27 = sld [smem:[#allocation12_spill]]  ;;  %s1225_s21 = sld [smem:[#allocation13_spill]] }
 0x18d   : > { %s1226_s12 = smov %s831_s13  ;;  %s1227_s13 = smov %s835_s14 }
 0x18e   : > { %s1228_s14 = smov %s986_s24  ;;  %s1229_s15 = smov %s843_s16 }
 0x18f   : > { %s1230_s16 = smov %s847_s17  ;;  %s1231_s17 = smov %s1222_s28 }
 0x190   : > { %s1232_s18 = smov %s859_s20  ;;  %21 = sbr.rel (!%p19_p1) target bundleno = 13 (0xd), region = 93 }
 0x192   : > { %s1233_s20 = smov %s1224_s27 }
 0x197   :  { %427 = vsyncpa [#allocation3], 1 }
 0x198   :  { %429 = vsyncpa [#allocation3 + $0x1], 1 }
 0x199   :  { %430 = vsyncpa [#allocation6], 1 }
 0x19a   :  { %432 = vsyncpa [#allocation6 + $0x1], 1 }
 0x19b   :  { %433 = vsyncpa [#allocation4], 1 }
 0x19c   :  { %435 = vsyncpa [#allocation4 + $0x1], 1 }

</bundles_post_ra>
